<compile_context>
chip_gen: v7x
topology: tpu7x:2x2x1
jax: 0.10.0
libtpu: 0.0.40
codegen_flags: <defaults>
</compile_context>

<pallas_src>
import jax
import jax.numpy as jnp
from jax import lax
from jax.experimental import pallas as pl
from jax.experimental.pallas import tpu as pltpu

F_IN = 16
HIDDEN = 256
LANE = 128


def _round_up(n, m):
    return -(-n // m) * m


# ---------------------------------------------------------------------------
# Default kernel: fully folded affine map.  x tile (T, 16) f32, folded weight
# (1, 16) f32, scalar bias in SMEM.  Output (1, T) is lane-dense.
# ---------------------------------------------------------------------------
def collapsed_kernel(x_ref, w_ref, b_ref, o_ref):
    o_ref[...] = lax.dot_general(
        w_ref[...], x_ref[...],
        dimension_numbers=(((1,), (1,)), ((), ())),   # contract shared 16-axis
        preferred_element_type=jnp.float32) + b_ref[0]


# ---------------------------------------------------------------------------
# Per-layer fused kernel (kept so nonlinearities can be inserted later).
# x tile (T, 16) bf16; hidden activations (256, T) f32; output (1, T) f32.
# ---------------------------------------------------------------------------
def fused_mlp_kernel(x_ref,
                     w1_ref, b1_ref,
                     w2_ref, b2_ref,
                     w3_ref, b3_ref,
                     w4_ref, b4_ref,
                     o_ref):
    cdt = w1_ref.dtype  # bf16 MXU inputs, f32 accumulation
    # Layer 1: contract the shared 16-axis (no wrapper transpose of x needed).
    h = lax.dot_general(w1_ref[...], x_ref[...],
                        dimension_numbers=(((1,), (1,)), ((), ())),
                        preferred_element_type=jnp.float32) + b1_ref[...]
    h = jnp.dot(w2_ref[...], h.astype(cdt),
                preferred_element_type=jnp.float32) + b2_ref[...]
    h = jnp.dot(w3_ref[...], h.astype(cdt),
                preferred_element_type=jnp.float32) + b3_ref[...]
    # Final layer: (1,256)@(256,T) -> lane-dense (1, T) slab; scalar bias from SMEM.
    o_ref[...] = jnp.dot(w4_ref[...], h.astype(cdt),
                         preferred_element_type=jnp.float32) + b4_ref[0]


def _choose_tile(batch, batch_tile):
    tile = min(_round_up(batch_tile, LANE), _round_up(batch, LANE))
    num_tiles = -(-batch // tile)
    return tile, num_tiles, num_tiles * tile


def net_forward(x, params, *, collapse=True, batch_tile=2048,
                compute_dtype=jnp.bfloat16):
    """x: (B, 16) float32; params in PyTorch layout (W: (out,in), b: (out,1)).

    Returns (B, 1) float32 matching Net.forward.
    """
    B, f_in = x.shape
    assert f_in == F_IN
    T, num_tiles, padded_B = _choose_tile(B, batch_tile)

    # Raise scoped VMEM only when the fused path's f32 intermediates get big
    # (v5e default scope is 16 MiB); 48 MiB keeps headroom under v7x's 64 MiB.
    vmem_limit = 48 * 1024 * 1024 if (not collapse and T >= 1024) else None
    cparams = pltpu.CompilerParams(
        dimension_semantics=("parallel",),
        vmem_limit_bytes=vmem_limit)

    if collapse:
        # --- fold the whole affine stack in f32 (wrapper side) -------------
        hp = jax.lax.Precision.HIGHEST
        w = params["w1"]                          # (256, 16)
        b = params["b1"]                          # (256, 1)
        for i in range(2, 5):
            w = jnp.dot(params[f"w{i}"], w, precision=hp)
            b = jnp.dot(params[f"w{i}"], b, precision=hp) + params[f"b{i}"]
        w = w.astype(jnp.float32)                 # (1, 16)
        b_s = b.reshape(1).astype(jnp.float32)    # (1,) scalar bias

        xp = x.astype(jnp.float32)
        if padded_B != B:
            xp = jnp.pad(xp, ((0, padded_B - B), (0, 0)))

        out = pl.pallas_call(
            collapsed_kernel,
            out_shape=jax.ShapeDtypeStruct((1, padded_B), jnp.float32),
            grid_spec=pltpu.PrefetchScalarGridSpec(
                num_scalar_prefetch=0,
                grid=(num_tiles,),
                in_specs=[
                    pl.BlockSpec((T, F_IN), lambda i: (i, 0)),      # x tile
                    pl.BlockSpec((1, F_IN), lambda i: (0, 0)),      # folded W
                    pl.BlockSpec(memory_space=pltpu.MemorySpace.SMEM),  # bias
                ],
                out_specs=pl.BlockSpec((1, T), lambda i: (0, i)),
            ),
            compiler_params=cparams,
            cost_estimate=pl.CostEstimate(
                flops=2 * padded_B * F_IN,
                transcendentals=0,
                bytes_accessed=xp.size * 4 + F_IN * 4 + 4 + padded_B * 4),
        )(xp, w, b_s)
        return out[0, :B].reshape(B, 1)

    # --- per-layer fused path (bf16 MXU inputs, f32 accumulation) ----------
    xp = x.astype(compute_dtype)      # halve the only per-step HBM stream
    if padded_B != B:
        xp = jnp.pad(xp, ((0, padded_B - B), (0, 0)))

    w = [params[f"w{i}"].astype(compute_dtype) for i in range(1, 5)]
    b = [params[f"b{i}"].astype(jnp.float32) for i in range(1, 4)]   # (256,1)
    b4 = params["b4"].reshape(1).astype(jnp.float32)                 # scalar

    def rep(arr):   # resident (replicated) block across the grid
        return pl.BlockSpec(arr.shape, lambda i: (0, 0))

    flops = 2 * padded_B * (F_IN * HIDDEN + 2 * HIDDEN * HIDDEN + HIDDEN)
    bytes_accessed = (xp.size * xp.dtype.itemsize
                      + sum(a.size * a.dtype.itemsize for a in w)
                      + sum(a.size * a.dtype.itemsize for a in b) + 4
                      + padded_B * 4)

    out = pl.pallas_call(
        fused_mlp_kernel,
        out_shape=jax.ShapeDtypeStruct((1, padded_B), jnp.float32),
        grid_spec=pltpu.PrefetchScalarGridSpec(
            num_scalar_prefetch=0,
            grid=(num_tiles,),
            in_specs=[
                pl.BlockSpec((T, F_IN), lambda i: (i, 0)),   # x tile (T,16)
                rep(w[0]), rep(b[0]),
                rep(w[1]), rep(b[1]),
                rep(w[2]), rep(b[2]),
                rep(w[3]),
                pl.BlockSpec(memory_space=pltpu.MemorySpace.SMEM),  # b4 scalar
            ],
            out_specs=pl.BlockSpec((1, T), lambda i: (0, i)),
        ),
        compiler_params=cparams,
        cost_estimate=pl.CostEstimate(flops=flops, transcendentals=0,
                                      bytes_accessed=bytes_accessed),
    )(xp, w[0], b[0], w[1], b[1], w[2], b[2], w[3], b4)
    return out[0, :B].reshape(B, 1)


# ---------------------------------------------------------------------------
# Deterministic init + references
# ---------------------------------------------------------------------------
def init_params(key):
    """PyTorch nn.Linear-style init: U(-1/sqrt(fan_in), 1/sqrt(fan_in)).
    W stored as (out, in), b as (out, 1)."""
    dims = [(16, 256), (256, 256), (256, 256), (256, 1)]
    params = {}
    for idx, (fan_in, fan_out) in enumerate(dims, start=1):
        key, kw, kb = jax.random.split(key, 3)
        bound = 1.0 / float(fan_in) ** 0.5
        params[f"w{idx}"] = jax.random.uniform(
            kw, (fan_out, fan_in), jnp.float32, -bound, bound)
        params[f"b{idx}"] = jax.random.uniform(
            kb, (fan_out, 1), jnp.float32, -bound, bound)
    return params


def reference_forward_f32(x, params):
    """Plain-JAX f32 reference of the PyTorch math (y = x W^T + b)."""
    hp = jax.lax.Precision.HIGHEST
    h = x
    for i in range(1, 5):
        h = jnp.dot(h, params[f"w{i}"].T, precision=hp) + params[f"b{i}"].T
    return h


def reference_forward_bf16(x, params, compute_dtype=jnp.bfloat16):
    """Layer-by-layer reference matching the fused kernel's bf16/f32 math."""
    hT = x.astype(compute_dtype).T
    for i in range(1, 5):
        w = params[f"w{i}"].astype(compute_dtype)
        hT = jnp.dot(w, hT.astype(compute_dtype),
                     preferred_element_type=jnp.float32) \
             + params[f"b{i}"].astype(jnp.float32)
    return hT.T


if __name__ == "__main__":
    key = jax.random.PRNGKey(0)
    k_params, k_x = jax.random.split(key)
    params = init_params(k_params)

    # Small batch (three 128-lane rows); features = 4*4 = 16 as in the module.
    B = 384
    x = jax.random.normal(k_x, (B, F_IN), jnp.float32)

    ref_f32 = reference_forward_f32(x, params)

    # Default (collapsed) path: whole affine stack folded, f32 end-to-end.
    out_c = jax.block_until_ready(net_forward(x, params, collapse=True))
    assert out_c.shape == (B, 1)
    assert jnp.allclose(out_c, ref_f32, atol=2e-3, rtol=2e-3), float(
        jnp.max(jnp.abs(out_c - ref_f32)))

    # Per-layer fused path (kept for future nonlinearities).
    out_f = jax.block_until_ready(net_forward(x, params, collapse=False))
    ref_bf16 = reference_forward_bf16(x, params)
    assert out_f.shape == (B, 1)
    assert jnp.allclose(out_f, ref_bf16, atol=5e-3, rtol=5e-3), float(
        jnp.max(jnp.abs(out_f - ref_bf16)))
    assert jnp.allclose(out_f, ref_f32, atol=1e-1, rtol=1e-1)

    # Ragged tiny batch: padded to one 128-lane tile inside the wrapper.
    x_small = x[:20]
    out_small = jax.block_until_ready(net_forward(x_small, params))
    assert out_small.shape == (20, 1)
    assert jnp.allclose(out_small, ref_f32[:20], atol=2e-3, rtol=2e-3)

    print("KERNEL_OK")
</pallas_src>

<mosaic_0001>
module attributes {stable_mosaic.version = 11 : i64} {
  func.func @collapsed_kernel(%arg0: i32, %arg1: memref<384x16xf32, #tpu.memory_space<vmem>>, %arg2: memref<1x16xf32, #tpu.memory_space<vmem>>, %arg3: memref<1xf32, #tpu.memory_space<smem>>, %arg4: memref<1x384xf32, #tpu.memory_space<vmem>>) attributes {dimension_semantics = [#tpu.dimension_semantics<parallel>], iteration_bounds = array<i64: 1>, scalar_prefetch = 0 : i64, scratch_operands = 0 : i64, tpu.core_type = #tpu.core_type<tc>, window_params = [{transform_indices = @transform_0, window_bounds = array<i64: 384, 16>}, {pipeline_mode = #tpu.pipeline_mode<synchronous>, transform_indices = @transform_1, window_bounds = array<i64: 1, 16>}, {transform_indices = @transform_2, window_bounds = array<i64: 1>}, {transform_indices = @transform_3, window_bounds = array<i64: 1, 384>}]} {
    %c0 = arith.constant 0 : index
    %c0_0 = arith.constant 0 : index
    %0 = vector.load %arg2[%c0, %c0_0] : memref<1x16xf32, #tpu.memory_space<vmem>>, vector<1x16xf32>
    %c0_1 = arith.constant 0 : index
    %c0_2 = arith.constant 0 : index
    %1 = vector.load %arg1[%c0_1, %c0_2] : memref<384x16xf32, #tpu.memory_space<vmem>>, vector<384x16xf32>
    %cst = arith.constant dense<0.000000e+00> : vector<1x384xf32>
    %2 = tpu.matmul %0, %1, %cst {dimension_numbers = #tpu.dot_dimension_numbers<[1], [1], [0], [0], [0, 0, 1, 0], [], []>} : vector<1x16xf32>, vector<384x16xf32>, vector<1x384xf32> -> vector<1x384xf32>
    %c0_3 = arith.constant 0 : index
    %3 = memref.load %arg3[%c0_3] : memref<1xf32, #tpu.memory_space<smem>>
    %4 = vector.broadcast %3 : f32 to vector<1x384xf32>
    %5 = arith.addf %2, %4 : vector<1x384xf32>
    %c0_4 = arith.constant 0 : index
    %c0_5 = arith.constant 0 : index
    %6 = vector.load %arg4[%c0_4, %c0_5] : memref<1x384xf32, #tpu.memory_space<vmem>>, vector<1x384xf32>
    tpu.vector_store %arg4[%c0_4, %c0_5], %5 {strides = array<i32>} : memref<1x384xf32, #tpu.memory_space<vmem>>, vector<1x384xf32>,
    return
  }
  func.func @transform_0(%arg0: i32) -> (i32, i32) {
    %c0_i32 = arith.constant 0 : i32
    %c0_i32_0 = arith.constant 0 : i32
    return %arg0, %c0_i32 : i32, i32
  }
  func.func @transform_1(%arg0: i32) -> (i32, i32) {
    %c0_i32 = arith.constant 0 : i32
    %c0_i32_0 = arith.constant 0 : i32
    %c0_i32_1 = arith.constant 0 : i32
    return %c0_i32, %c0_i32_0 : i32, i32
  }
  func.func @transform_2(%arg0: i32) -> i32 {
    %c0_i32 = arith.constant 0 : i32
    %c0_i32_0 = arith.constant 0 : i32
    return %c0_i32 : i32
  }
  func.func @transform_3(%arg0: i32) -> (i32, i32) {
    %c0_i32 = arith.constant 0 : i32
    %c0_i32_0 = arith.constant 0 : i32
    return %c0_i32, %arg0 : i32, i32
  }
}

</mosaic_0001>

<bundles_post_ra>
// kernel: tpu_custom_call.1
= control target key start
LH: loop header
LB: loop body
LE: loop exit
PB: predicated region body
PF: predicated region fallthrough
CT: control target
= control target key end

     0   :  { %vm67_vm0 = vcmask 130048   ;;  %v647_v6 = vmov 0.0|0.0   ;;  %vm648_vm2 = vmmov 0   ;;  %v649_v12 = vmov 0.0   ;;  %s904_s0 = inlined_call_operand.vmem [shape: f32[384,16], index: 0, kind: input, shape index: {}]   ;;  %s905_s1 = inlined_call_operand.vmem [shape: f32[1,16], index: 1, kind: input, shape index: {}]   ;;  %s906_s2 = inlined_call_operand.<no memory space> [shape: f32[1], index: 2, kind: input, shape index: {}]   ;;  %s907_s3 = inlined_call_operand.hbm [shape: f32[1,384], index: 3, kind: output, shape index: {}]  }
   0x1   :  { %v33_v0 = vld [vmem:[%s904_s0 + $0x80] sm:$0xff]  ;;  %v34_v1 = vld [vmem:[%s904_s0 + $0x88] sm:$0xff]  ;;  %vm683_vm1 = vmpackc.low %vm67_vm0, %vm67_vm0  ;;  %586 = vmatprep.subr.bf16.mxu1 %v647_v6  ;;  %535 = vmatprep.mubr.msk.f32.mxu1 %vm648_vm2, %v649_v12 }
   0x2   :  { %v17_v2 = vld [vmem:[%s904_s0] sm:$0xff]  ;;  %v538_v3 = vpack.c.bf16 %v34_v1, %v33_v0  ;;  %v18_v5 = vld [vmem:[%s904_s0 + $0x8] sm:$0xff]  ;;  %v35_v10 = vld [vmem:[%s904_s0 + $0x90] sm:$0xff] }
   0x3   :  { %v49_v7 = vld [vmem:[%s904_s0 + $0x100] sm:$0xff]  ;;  %v541_v8 = vpack.c.bf16 %v18_v5, %v17_v2  ;;  %v50_v9 = vld [vmem:[%s904_s0 + $0x108] sm:$0xff]  ;;  %v36_v11 = vld [vmem:[%s904_s0 + $0x98] sm:$0xff] }
   0x4   :  { %540 = vmatprep.subr.msk.bf16.mxu0 %vm683_vm1, %v538_v3  ;;  %v587_v13 = vpack.c.bf16 %v50_v9, %v49_v7  ;;  %v544_v14 = vpack.c.bf16 %v36_v11, %v35_v10  ;;  %v19_v15 = vld [vmem:[%s904_s0 + $0x10] sm:$0xff]  ;;  %v20_v16 = vld [vmem:[%s904_s0 + $0x18] sm:$0xff]  ;;  %v37_v19 = vld [vmem:[%s904_s0 + $0xa0] sm:$0xff] }
   0x5   :  { %543 = vmatpush3.bf16.xpose.msk.msra.mxu0 %vm683_vm1, %v541_v8  ;;  %v51_v17 = vld [vmem:[%s904_s0 + $0x110] sm:$0xff]  ;;  %v52_v18 = vld [vmem:[%s904_s0 + $0x118] sm:$0xff]  ;;  %v38_v20 = vld [vmem:[%s904_s0 + $0xa8] sm:$0xff]  ;;  %v547_v21 = vpack.c.bf16 %v20_v16, %v19_v15 }
   0x6   :  { %589 = vmatpush3.bf16.xpose.msk.msra.mxu1 %vm683_vm1, %v587_v13  ;;  %546 = vmatprep.subr.msk.bf16.mxu0 %vm683_vm1, %v544_v14  ;;  %v591_v22 = vpack.c.bf16 %v52_v18, %v51_v17  ;;  %v550_v23 = vpack.c.bf16 %v38_v20, %v37_v19  ;;  %v21_v24 = vld [vmem:[%s904_s0 + $0x20] sm:$0xff]  ;;  %v22_v25 = vld [vmem:[%s904_s0 + $0x28] sm:$0xff]  ;;  %v39_v28 = vld [vmem:[%s904_s0 + $0xb0] sm:$0xff] }
   0x7   :  { %590 = vmatprep.subr.bf16.mxu1 %v647_v6  ;;  %v53_v26 = vld [vmem:[%s904_s0 + $0x120] sm:$0xff]  ;;  %v54_v27 = vld [vmem:[%s904_s0 + $0x128] sm:$0xff]  ;;  %v40_v29 = vld [vmem:[%s904_s0 + $0xb8] sm:$0xff]  ;;  %v553_v30 = vpack.c.bf16 %v22_v25, %v21_v24 }
   0x8   :  { %v758_v31 = vld [vmem:[%s905_s1] sm:$0x1] }
   0xd   :  { %549 = vmatpush3.bf16.xpose.msk.msra.mxu0 %vm683_vm1, %v547_v21 }
   0xe   :  { %593 = vmatpush3.bf16.xpose.msk.msra.mxu1 %vm683_vm1, %v591_v22  ;;  %552 = vmatprep.subr.msk.bf16.mxu0 %vm683_vm1, %v550_v23 }
   0xf   :  { %594 = vmatprep.subr.bf16.mxu1 %v647_v6 }
  0x10   :  { %9 = vsyncpa [#allocation4], 0  ;;  %v595_v32 = vpack.c.bf16 %v54_v27, %v53_v26  ;;  %v556_v33 = vpack.c.bf16 %v40_v29, %v39_v28  ;;  %484 = vmatprep.mubr.msk.f32.mxu0 %vm67_vm0, %v758_v31  ;;  %v23_v34 = vld [vmem:[%s904_s0 + $0x30] sm:$0xff]  ;;  %v24_v35 = vld [vmem:[%s904_s0 + $0x38] sm:$0xff]  ;;  %v363_v15 = vlaneseq  ;;  %v66_v18 = vstv %s906_s2  ;;  %s651_s28 = smov [#allocation3]  }
  0x11   :  { %v55_v36 = vld [vmem:[%s904_s0 + $0x130] sm:$0xff]  ;;  %v56_v37 = vld [vmem:[%s904_s0 + $0x138] sm:$0xff]  ;;  %v41_v38 = vld [vmem:[%s904_s0 + $0xc0] sm:$0xff]  ;;  %v559_v40 = vpack.c.bf16 %v24_v35, %v23_v34  ;;  %s394_s1 = sshll.u32 %s651_s28, 4  ;;  %s395_s1 = int_to_ptr.vmem [resolvable:$true] %s394_s1 }
  0x12   :  { %v42_v39 = vld [vmem:[%s904_s0 + $0xc8] sm:$0xff]  ;;  %v599_v41 = vpack.c.bf16 %v56_v37, %v55_v36  ;;  %v25_v43 = vld [vmem:[%s904_s0 + $0x40] sm:$0xff]  ;;  %v43_v47 = vld [vmem:[%s904_s0 + $0xd0] sm:$0xff]  ;;  %v364_v17 = vshrl.u32 %v363_v15, 7  ;;  %vm385_vm3 = vcmp.lt.s32.totalorder %v363_v15, 384  ;;  %s623_s29 = scalar_lea.vmem %s395_s1, 48  ;;  %p628_p1 = scmp.lt.s32.totalorder %s395_s1, %s395_s1 }
  0x13   :  { %v562_v42 = vpack.c.bf16 %v42_v39, %v41_v38  ;;  %v26_v44 = vld [vmem:[%s904_s0 + $0x48] sm:$0xff]  ;;  %v57_v45 = vld [vmem:[%s904_s0 + $0x140] sm:$0xff]  ;;  %v44_v48 = vld [vmem:[%s904_s0 + $0xd8] sm:$0xff]  ;;  %p624_p0 = scmp.ne.s32.totalorder %s395_s1, %s623_s29  ;;  %s627_s2 = scalar_lea.vmem %s395_s1, 64 }
  0x14   :  { %v58_v46 = vld [vmem:[%s904_s0 + $0x148] sm:$0xff]  ;;  %v565_v49 = vpack.c.bf16 %v26_v44, %v25_v43  ;;  %v568_v51 = vpack.c.bf16 %v44_v48, %v43_v47  ;;  %v27_v52 = vld [vmem:[%s904_s0 + $0x50] sm:$0xff]  ;;  %v28_v53 = vld [vmem:[%s904_s0 + $0x58] sm:$0xff]  ;;  %p629_p2 = scmp.lt.s32.totalorder %s627_s2, %s623_s29 }
  0x15   :  { %555 = vmatpush3.bf16.xpose.msk.msra.mxu0 %vm683_vm1, %v553_v30  ;;  %v603_v50 = vpack.c.bf16 %v58_v46, %v57_v45  ;;  %v59_v54 = vld [vmem:[%s904_s0 + $0x150] sm:$0xff]  ;;  %v60_v55 = vld [vmem:[%s904_s0 + $0x158] sm:$0xff]  ;;  %v45_v56 = vld [vmem:[%s904_s0 + $0xe0] sm:$0xff]  ;;  %v571_v58 = vpack.c.bf16 %v28_v53, %v27_v52 }
  0x16   :  { %597 = vmatpush3.bf16.xpose.msk.msra.mxu1 %vm683_vm1, %v595_v32  ;;  %558 = vmatprep.subr.msk.bf16.mxu0 %vm683_vm1, %v556_v33  ;;  %v46_v57 = vld [vmem:[%s904_s0 + $0xe8] sm:$0xff]  ;;  %v607_v59 = vpack.c.bf16 %v60_v55, %v59_v54  ;;  %v29_v61 = vld [vmem:[%s904_s0 + $0x60] sm:$0xff]  ;;  %v47_v1 = vld [vmem:[%s904_s0 + $0xf0] sm:$0xff]  ;;  %p630_p3 = por %p629_p2, %p628_p1 }
  0x17   :  { %598 = vmatprep.subr.bf16.mxu1 %v647_v6  ;;  %v574_v60 = vpack.c.bf16 %v46_v57, %v45_v56  ;;  %v30_v62 = vld [vmem:[%s904_s0 + $0x68] sm:$0xff]  ;;  %v61_v63 = vld [vmem:[%s904_s0 + $0x160] sm:$0xff]  ;;  %v48_v2 = vld [vmem:[%s904_s0 + $0xf8] sm:$0xff] }
  0x18   :  { %v62_v0 = vld [vmem:[%s904_s0 + $0x168] sm:$0xff]  ;;  %v577_v3 = vpack.c.bf16 %v30_v62, %v29_v61  ;;  %v580_v7 = vpack.c.bf16 %v48_v2, %v47_v1  ;;  %v31_v8 = vld [vmem:[%s904_s0 + $0x70] sm:$0xff]  ;;  %v32_v9 = vld [vmem:[%s904_s0 + $0x78] sm:$0xff]  ;;  %p631_p4 = pnand %p630_p3, %p624_p0 }
  0x19   :  { %v611_v5 = vpack.c.bf16 %v62_v0, %v61_v63  ;;  %v63_v10 = vld [vmem:[%s904_s0 + $0x170] sm:$0xff]  ;;  %v64_v11 = vld [vmem:[%s904_s0 + $0x178] sm:$0xff]  ;;  %v583_v12 = vpack.c.bf16 %v32_v9, %v31_v8 }
  0x1a   :  { %v615_v13 = vpack.c.bf16 %v64_v11, %v63_v10 }
  0x1d   :  { %561 = vmatpush3.bf16.xpose.msk.msra.mxu0 %vm683_vm1, %v559_v40 }
  0x1e   :  { %601 = vmatpush3.bf16.xpose.msk.msra.mxu1 %vm683_vm1, %v599_v41  ;;  %564 = vmatprep.subr.msk.bf16.mxu0 %vm683_vm1, %v562_v42 }
  0x1f   :  { %602 = vmatprep.subr.bf16.mxu1 %v647_v6 }
  0x25   :  { %567 = vmatpush3.bf16.xpose.msk.msra.mxu0 %vm683_vm1, %v565_v49 }
  0x26   :  { %605 = vmatpush3.bf16.xpose.msk.msra.mxu1 %vm683_vm1, %v603_v50  ;;  %570 = vmatprep.subr.msk.bf16.mxu0 %vm683_vm1, %v568_v51 }
  0x27   :  { %606 = vmatprep.subr.bf16.mxu1 %v647_v6 }
  0x2d   :  { %573 = vmatpush3.bf16.xpose.msk.msra.mxu0 %vm683_vm1, %v571_v58 }
  0x2e   :  { %609 = vmatpush3.bf16.xpose.msk.msra.mxu1 %vm683_vm1, %v607_v59  ;;  %576 = vmatprep.subr.msk.bf16.mxu0 %vm683_vm1, %v574_v60 }
  0x2f   :  { %610 = vmatprep.subr.bf16.mxu1 %v647_v6 }
  0x35   :  { %579 = vmatpush3.bf16.xpose.msk.msra.mxu0 %vm683_vm1, %v577_v3 }
  0x36   :  { %613 = vmatpush3.bf16.xpose.msk.msra.mxu1 %vm683_vm1, %v611_v5  ;;  %582 = vmatprep.subr.msk.bf16.mxu0 %vm683_vm1, %v580_v7 }
  0x37   :  { %614 = vmatprep.subr.bf16.mxu1 %v647_v6  ;;  %v650_v6 = vmov 1966171168  }
  0x38   :  { %v361_v14 = vunpack.c.l.s4 %v650_v6 }
  0x3a   :  { %v362_v16 = vunpack.c.0.s8 %v361_v14 }
  0x3c   :  { %v365_v20 = vsub.s32 %v362_v16, %v364_v17 }
  0x3d   :  { %585 = vmatpush3.bf16.xpose.msk.msra.mxu0 %vm683_vm1, %v583_v12 }
  0x3e   :  { %617 = vmatpush3.bf16.xpose.msk.msra.mxu1 %vm683_vm1, %v615_v13 }
  0x44   :  { %485 = vmatmul.mubr.msk.f32.vlgmr.msra.gmra.mrb[0].mxu0 %vm67_vm0, %v758_v31 }
  0x45   :  { %536 = vmatmul.mubr.msk.f32.vlgmr.msra.gmra.mrb[0].mxu1 %vm67_vm0, %v758_v31 }
 0x117   :  { %v281_v19 = vpop.f32.mrb[0].mxu0 }
 0x118   :  { %v282_v21 = vadd.f32 %v281_v19, %v66_v18  ;;  %v283_v4 = vpop.f32.mrb[1].mxu0  ;;  %v352_v22 = vpop.f32.mrb[0].mxu1 }
 0x119   :  { %v284_v23 = vadd.f32 %v283_v4, %v66_v18  ;;  %v353_v24 = vadd.f32 %v352_v22, %v66_v18  ;;  %v537_v25 = vpop.f32.mrb[1].mxu1 }
 0x11b   :  { %v359_v26 = vcombine.low %v282_v21, %v284_v23  ;;  %v373_v27 = vrot.slane %v353_v24, %v365_v20 }
 0x11d   :  { %v366_v28 = vrot.slane %v359_v26, %v365_v20 }
 0x11f   :  { %v374_v29 = vcombine.low %v366_v28, %v373_v27 }
 0x121   :  { %v381_v30 = vrot.slane %v374_v29, %v365_v20 }
 0x123   :  { %387 = vst.msk [vmem:[#allocation3] sm:$0x7] %vm385_vm3, %v381_v30 }
 0x124   :  { %634 = shalt.err (!%p631_p4)
}
 0x125   :  { %s635_s5 = scalar_lea.hbm %s907_s3, 48 }
 0x126   :  { %p636_p5 = scmp.ne.s32.totalorder %s907_s3, %s635_s5  ;;  %p639_p6 = scmp.lt.u32.totalorder %s635_s5, %s907_s3 }
 0x128   :  { %p641_p7 = pnand %p639_p6, %p636_p5 }
 0x12a   :  { %644 = shalt.err (!%p641_p7)
}
 0x12b   :  { %397 = dma.vmem_to_hbm [thread:$0]  %s395_s1, 48, %s907_s3, [#allocation4]  }
 0x12c   :  { %645 = dma.done.wait [#allocation4], 48  }
 0x12d   :  { %646 = vsyncadd [#allocation4], 4294967248 }
 0x12e   :  { %401 = vsyncpa [#allocation4], 1 }

</bundles_post_ra>
